<compile_context>
chip_gen: v5e
topology: v5e:2x2
jax: 0.10.0
libtpu: 0.0.40
codegen_flags: <defaults>
</compile_context>

<pallas_src>
import jax
import jax.numpy as jnp
from jax.experimental import pallas as pl
from jax.experimental.pallas import tpu as pltpu

# Matcher / BoxCoder constants (torchvision RoIHeads defaults-ish)
LOW_THRESH = 0.3
HIGH_THRESH = 0.7
BBOX_WEIGHTS = (10.0, 10.0, 5.0, 5.0)
_EPS = 1e-6


def _proposal_sampler_kernel(prop_ref, gtc_ref, gtr_ref,
                             reg_ref, lab_ref, midx_ref):
    # prop_ref: (4, Bblk, P) f32  proposals, coordinate-major, batch-dense
    # gtc_ref:  (Bblk, G, 4) f32  GT boxes with G on the sublane axis (columns)
    # gtr_ref:  (Bblk, 16, G) f32 GT value planes [hi(5) | mid(5) | lo(5) | 0]
    #                             for the one-hot gather matmul LHS
    px1 = prop_ref[0]                      # (Bblk, P) dense slabs
    py1 = prop_ref[1]
    px2 = prop_ref[2]
    py2 = prop_ref[3]
    Bblk, P = px1.shape

    gx1 = gtc_ref[:, :, 0:1]               # (Bblk, G, 1) columns -- no relayout
    gy1 = gtc_ref[:, :, 1:2]
    gx2 = gtc_ref[:, :, 2:3]
    gy2 = gtc_ref[:, :, 3:4]
    G = gx1.shape[1]

    # ---------------- box_iou(gt, proposals): (Bblk, G, P) ----------------
    area_p = ((px2 - px1) * (py2 - py1))[:, None, :]        # (Bblk, 1, P)
    area_g = (gx2 - gx1) * (gy2 - gy1)                      # (Bblk, G, 1)
    lt_x = jnp.maximum(gx1, px1[:, None, :])
    lt_y = jnp.maximum(gy1, py1[:, None, :])
    rb_x = jnp.minimum(gx2, px2[:, None, :])
    rb_y = jnp.minimum(gy2, py2[:, None, :])
    inter = jnp.maximum(rb_x - lt_x, 0.0) * jnp.maximum(rb_y - lt_y, 0.0)
    union = area_g + area_p - inter
    # exact divide (keeps 0.3/0.7 threshold decisions faithful); the epsilon
    # clamp only protects degenerate / zero-padded boxes from 0/0 NaN.
    iou = inter / jnp.maximum(union, _EPS)                  # (Bblk, G, P)

    # ------------- proposal matcher (allow_low_quality_matches=False) ------
    matched_vals = jnp.max(iou, axis=1)                     # (Bblk, P)
    g_iota = jax.lax.broadcasted_iota(
        jnp.int32, (Bblk, G, P), 1).astype(jnp.float32)     # (Bblk, G, P)
    is_max = iou >= matched_vals[:, None, :]
    # first GT index attaining the max (== argmax over axis 1), kept in f32
    matches_f = jnp.min(jnp.where(is_max, g_iota, float(G)), axis=1)   # (Bblk,P)
    clamped_f = jnp.where(matched_vals >= HIGH_THRESH, matches_f, 0.0)

    # ------------- matched-GT gather as a one-hot matmul on the MXU --------
    onehot = (g_iota == clamped_f[:, None, :]).astype(jnp.float32)     # (Bblk,G,P)
    gathered = jnp.einsum('bcg,bgp->bcp', gtr_ref[...], onehot,
                          preferred_element_type=jnp.float32)          # (Bblk,16,P)

    def _gather_val(c):
        # hi + mid + lo planes reconstruct the f32 value exactly
        return gathered[:, c, :] + gathered[:, c + 5, :] + gathered[:, c + 10, :]

    mgx1 = _gather_val(0)
    mgy1 = _gather_val(1)
    mgx2 = _gather_val(2)
    mgy2 = _gather_val(3)
    lab_g = (_gather_val(4) + 0.5).astype(jnp.int32)                   # (Bblk, P)

    labels = jnp.where(matched_vals < LOW_THRESH, 0,                   # background
                       jnp.where(matched_vals < HIGH_THRESH, -1,       # ignore
                                 lab_g))

    # ---------------- box_coder.encode ----------------
    wx, wy, ww, wh = BBOX_WEIGHTS
    ew = px2 - px1
    eh = py2 - py1
    ecx = px1 + 0.5 * ew
    ecy = py1 + 0.5 * eh
    gw = mgx2 - mgx1
    gh = mgy2 - mgy1
    gcx = mgx1 + 0.5 * gw
    gcy = mgy1 + 0.5 * gh
    inv_ew = pl.reciprocal(jnp.maximum(ew, _EPS), approx=True)   # EUP, not VALU
    inv_eh = pl.reciprocal(jnp.maximum(eh, _EPS), approx=True)
    dx = wx * (gcx - ecx) * inv_ew
    dy = wy * (gcy - ecy) * inv_eh
    dw = ww * (jnp.log(jnp.maximum(gw, _EPS)) - jnp.log(jnp.maximum(ew, _EPS)))
    dh = wh * (jnp.log(jnp.maximum(gh, _EPS)) - jnp.log(jnp.maximum(eh, _EPS)))

    # single lane-dense slab store for the regression targets
    reg_ref[...] = jnp.stack([dx, dy, dw, dh], axis=0)       # (4, Bblk, P)
    lab_ref[...] = labels
    midx_ref[...] = clamped_f.astype(jnp.int32)


def _split_bf16x3(x):
    """Split f32 into three bf16-exact f32 planes with hi+mid+lo ~= x (<=1 ulp)."""
    hi = x.astype(jnp.bfloat16).astype(jnp.float32)
    r = x - hi
    mid = r.astype(jnp.bfloat16).astype(jnp.float32)
    lo = r - mid
    return hi, mid, lo


def proposal_sampler(proposals, gt_boxes, gt_labels, priors=None,
                     add_gt_to_proposals=True, coord_major_out=False):
    """proposals: [B, N, 4] f32; gt_boxes: [B, G, 4] f32; gt_labels: [B, G] int.

    Same forward semantics as the PyTorch ProposalSampler (with the
    list-of-images replaced by a zero-padded fixed-size batch).  With
    coord_major_out=True the regression targets are returned as [4, B, P]
    (skips the output transpose pass for large P).
    """
    proposals = proposals.astype(jnp.float32)
    gt_boxes = gt_boxes.astype(jnp.float32)

    if add_gt_to_proposals:                      # add_gt_proposals()
        proposals = jnp.concatenate([proposals, gt_boxes], axis=1)

    B, P, _ = proposals.shape
    G = gt_boxes.shape[1]

    # lane-dense padding of the proposal axis (unmasked stores, aligned tiles)
    P_pad = ((P + 127) // 128) * 128
    # batch blocking: whole batch in one step for small B; otherwise 8 images
    # per step (full sublane occupancy) which also keeps >=2 parallel grid
    # steps for dual-TensorCore chips once B >= 16.
    if B <= 8:
        Bblk, B_pad = B, B
    else:
        Bblk = 8
        B_pad = ((B + 7) // 8) * 8

    # coordinate-major / batch-dense proposals: [4, B_pad, P_pad]
    prop_t = jnp.transpose(proposals, (2, 0, 1))
    prop_t = jnp.pad(prop_t, ((0, 0), (0, B_pad - B), (0, P_pad - P)))

    # GT "columns" (G on the sublane axis) for the IoU broadcasts
    gt_cols = jnp.pad(gt_boxes, ((0, B_pad - B), (0, 0), (0, 0)))      # [B_pad,G,4]

    # GT "rows" [x1,y1,x2,y2,label] split into bf16-exact hi/mid/lo planes so
    # the one-hot gather matmul is exact at any MXU contraction precision.
    gt_vals = jnp.concatenate(
        [jnp.transpose(gt_boxes, (0, 2, 1)),                           # [B, 4, G]
         gt_labels.astype(jnp.float32)[:, None, :]], axis=1)           # [B, 5, G]
    hi, mid, lo = _split_bf16x3(gt_vals)
    gt_rows = jnp.concatenate(
        [hi, mid, lo, jnp.zeros((B, 1, G), jnp.float32)], axis=1)      # [B, 16, G]
    gt_rows = jnp.pad(gt_rows, ((0, B_pad - B), (0, 0), (0, 0)))

    grid = (B_pad // Bblk,)
    reg_t, labels, midx = pl.pallas_call(
        _proposal_sampler_kernel,
        out_shape=(
            jax.ShapeDtypeStruct((4, B_pad, P_pad), jnp.float32),
            jax.ShapeDtypeStruct((B_pad, P_pad), jnp.int32),
            jax.ShapeDtypeStruct((B_pad, P_pad), jnp.int32),
        ),
        grid_spec=pltpu.PrefetchScalarGridSpec(
            num_scalar_prefetch=0,
            grid=grid,
            in_specs=[
                pl.BlockSpec((4, Bblk, P_pad), lambda b: (0, b, 0)),
                pl.BlockSpec((Bblk, G, 4), lambda b: (b, 0, 0)),
                pl.BlockSpec((Bblk, 16, G), lambda b: (b, 0, 0)),
            ],
            out_specs=[
                pl.BlockSpec((4, Bblk, P_pad), lambda b: (0, b, 0)),
                pl.BlockSpec((Bblk, P_pad), lambda b: (b, 0)),
                pl.BlockSpec((Bblk, P_pad), lambda b: (b, 0)),
            ],
        ),
        compiler_params=pltpu.CompilerParams(
            dimension_semantics=("parallel",)),
    )(prop_t, gt_cols, gt_rows)

    reg_t = reg_t[:, :B, :P]
    labels = labels[:B, :P]
    midx = midx[:B, :P]
    regression_targets = reg_t if coord_major_out else jnp.transpose(reg_t, (1, 2, 0))

    return {
        'regression_targets': regression_targets,   # [B, P, 4] (or [4, B, P])
        'labels': labels,                            # [B, P] i32
        'proposals': proposals,                      # [B, P, 4]
        'priors': priors,
        'matched_idxs': midx,                        # [B, P] i32
    }


# ------------------------- pure-jnp reference -------------------------
def _reference(proposals, gt_boxes, gt_labels, add_gt_to_proposals=True):
    proposals = proposals.astype(jnp.float32)
    gt_boxes = gt_boxes.astype(jnp.float32)
    if add_gt_to_proposals:
        proposals = jnp.concatenate([proposals, gt_boxes], axis=1)

    def one_image(prop, gt, lab):
        px1, py1, px2, py2 = prop[:, 0], prop[:, 1], prop[:, 2], prop[:, 3]
        gx1, gy1, gx2, gy2 = gt[:, 0], gt[:, 1], gt[:, 2], gt[:, 3]
        area_p = (px2 - px1) * (py2 - py1)
        area_g = (gx2 - gx1) * (gy2 - gy1)
        lt_x = jnp.maximum(gx1[:, None], px1[None, :])
        lt_y = jnp.maximum(gy1[:, None], py1[None, :])
        rb_x = jnp.minimum(gx2[:, None], px2[None, :])
        rb_y = jnp.minimum(gy2[:, None], py2[None, :])
        inter = jnp.maximum(rb_x - lt_x, 0.0) * jnp.maximum(rb_y - lt_y, 0.0)
        union = area_g[:, None] + area_p[None, :] - inter
        iou = inter / jnp.maximum(union, _EPS)
        mv = jnp.max(iou, axis=0)
        m = jnp.argmax(iou, axis=0)
        clamped = jnp.where(mv >= HIGH_THRESH, m, 0)
        labels = jnp.where(mv < LOW_THRESH, 0,
                           jnp.where(mv < HIGH_THRESH, -1, lab[clamped]))
        mg = gt[clamped]
        wx, wy, ww, wh = BBOX_WEIGHTS
        ew = px2 - px1
        eh = py2 - py1
        ecx = px1 + 0.5 * ew
        ecy = py1 + 0.5 * eh
        gw = mg[:, 2] - mg[:, 0]
        gh = mg[:, 3] - mg[:, 1]
        gcx = mg[:, 0] + 0.5 * gw
        gcy = mg[:, 1] + 0.5 * gh
        reg = jnp.stack([wx * (gcx - ecx) / ew, wy * (gcy - ecy) / eh,
                         ww * jnp.log(gw / ew), wh * jnp.log(gh / eh)], axis=-1)
        return reg, labels.astype(jnp.int32), clamped.astype(jnp.int32)

    return jax.vmap(one_image)(proposals, gt_boxes, gt_labels)


def _make_boxes(key, b, n, lo, hi, wlo, whi):
    k1, k2, k3, k4 = jax.random.split(key, 4)
    x1 = jax.random.uniform(k1, (b, n), minval=lo, maxval=hi)
    y1 = jax.random.uniform(k2, (b, n), minval=lo, maxval=hi)
    w = jax.random.uniform(k3, (b, n), minval=wlo, maxval=whi)
    h = jax.random.uniform(k4, (b, n), minval=wlo, maxval=whi)
    return jnp.stack([x1, y1, x1 + w, y1 + h], axis=-1).astype(jnp.float32)


if __name__ == "__main__":
    key = jax.random.PRNGKey(0)
    kp, kg, kl = jax.random.split(key, 3)

    B, N0, G = 2, 120, 8          # 120 proposals + 8 gt -> P = 128 (lane-dense)
    proposals = _make_boxes(kp, B, N0, 0.0, 60.0, 4.0, 30.0)    # [2, 120, 4]
    gt_boxes = _make_boxes(kg, B, G, 0.0, 60.0, 8.0, 30.0)      # [2, 8, 4]
    gt_labels = jax.random.randint(kl, (B, G), 1, 6, dtype=jnp.int32)

    out = proposal_sampler(proposals, gt_boxes, gt_labels,
                           add_gt_to_proposals=True)
    jax.block_until_ready(out)

    # checks against a pure-jnp reference
    reg_r, lab_r, midx_r = _reference(proposals, gt_boxes, gt_labels)
    assert out['regression_targets'].shape == (B, N0 + G, 4)
    assert out['labels'].shape == (B, N0 + G)
    assert out['matched_idxs'].shape == (B, N0 + G)
    assert bool(jnp.all(out['labels'] == lab_r))
    assert bool(jnp.all(out['matched_idxs'] == midx_r))
    assert bool(jnp.allclose(out['regression_targets'], reg_r,
                             rtol=5e-3, atol=1e-3))
    # gt boxes appended to proposals match themselves -> ~zero encoding and
    # positive labels
    assert bool(jnp.all(jnp.abs(out['regression_targets'][:, N0:, :]) < 1e-3))
    assert bool(jnp.all(out['labels'][:, N0:] >= 1))

    print("KERNEL_OK")
</pallas_src>

<mosaic_0001>
module attributes {stable_mosaic.version = 11 : i64} {
  func.func @_proposal_sampler_kernel(%arg0: i32, %arg1: memref<4x2x128xf32, #tpu.memory_space<vmem>>, %arg2: memref<2x8x4xf32, #tpu.memory_space<vmem>>, %arg3: memref<2x16x8xf32, #tpu.memory_space<vmem>>, %arg4: memref<4x2x128xf32, #tpu.memory_space<vmem>>, %arg5: memref<2x128xi32, #tpu.memory_space<vmem>>, %arg6: memref<2x128xi32, #tpu.memory_space<vmem>>) attributes {dimension_semantics = [#tpu.dimension_semantics<parallel>], iteration_bounds = array<i64: 1>, scalar_prefetch = 0 : i64, scratch_operands = 0 : i64, tpu.core_type = #tpu.core_type<tc>, window_params = [{transform_indices = @transform_0, window_bounds = array<i64: 4, 2, 128>}, {transform_indices = @transform_1, window_bounds = array<i64: 2, 8, 4>}, {transform_indices = @transform_2, window_bounds = array<i64: 2, 16, 8>}, {transform_indices = @transform_3, window_bounds = array<i64: 4, 2, 128>}, {transform_indices = @transform_4, window_bounds = array<i64: 2, 128>}, {transform_indices = @transform_5, window_bounds = array<i64: 2, 128>}]} {
    %c0 = arith.constant 0 : index
    %c0_0 = arith.constant 0 : index
    %c0_1 = arith.constant 0 : index
    %0 = vector.load %arg1[%c0, %c0_0, %c0_1] : memref<4x2x128xf32, #tpu.memory_space<vmem>>, vector<1x2x128xf32>
    %1 = vector.shape_cast %0 : vector<1x2x128xf32> to vector<2x128xf32>
    %c1 = arith.constant 1 : index
    %c0_2 = arith.constant 0 : index
    %c0_3 = arith.constant 0 : index
    %2 = vector.load %arg1[%c1, %c0_2, %c0_3] : memref<4x2x128xf32, #tpu.memory_space<vmem>>, vector<1x2x128xf32>
    %3 = vector.shape_cast %2 : vector<1x2x128xf32> to vector<2x128xf32>
    %c2 = arith.constant 2 : index
    %c0_4 = arith.constant 0 : index
    %c0_5 = arith.constant 0 : index
    %4 = vector.load %arg1[%c2, %c0_4, %c0_5] : memref<4x2x128xf32, #tpu.memory_space<vmem>>, vector<1x2x128xf32>
    %5 = vector.shape_cast %4 : vector<1x2x128xf32> to vector<2x128xf32>
    %c3 = arith.constant 3 : index
    %c0_6 = arith.constant 0 : index
    %c0_7 = arith.constant 0 : index
    %6 = vector.load %arg1[%c3, %c0_6, %c0_7] : memref<4x2x128xf32, #tpu.memory_space<vmem>>, vector<1x2x128xf32>
    %7 = vector.shape_cast %6 : vector<1x2x128xf32> to vector<2x128xf32>
    %c0_8 = arith.constant 0 : index
    %c0_9 = arith.constant 0 : index
    %c0_10 = arith.constant 0 : index
    %8 = vector.load %arg2[%c0_8, %c0_9, %c0_10] : memref<2x8x4xf32, #tpu.memory_space<vmem>>, vector<2x8x1xf32>
    %c0_11 = arith.constant 0 : index
    %c0_12 = arith.constant 0 : index
    %c1_13 = arith.constant 1 : index
    %9 = vector.load %arg2[%c0_11, %c0_12, %c1_13] : memref<2x8x4xf32, #tpu.memory_space<vmem>>, vector<2x8x1xf32>
    %c0_14 = arith.constant 0 : index
    %c0_15 = arith.constant 0 : index
    %c2_16 = arith.constant 2 : index
    %10 = vector.load %arg2[%c0_14, %c0_15, %c2_16] : memref<2x8x4xf32, #tpu.memory_space<vmem>>, vector<2x8x1xf32>
    %c0_17 = arith.constant 0 : index
    %c0_18 = arith.constant 0 : index
    %c3_19 = arith.constant 3 : index
    %11 = vector.load %arg2[%c0_17, %c0_18, %c3_19] : memref<2x8x4xf32, #tpu.memory_space<vmem>>, vector<2x8x1xf32>
    %12 = arith.subf %5, %1 : vector<2x128xf32>
    %13 = arith.subf %7, %3 : vector<2x128xf32>
    %14 = arith.mulf %12, %13 : vector<2x128xf32>
    %15 = vector.shape_cast %14 : vector<2x128xf32> to vector<2x1x128xf32>
    %16 = arith.subf %10, %8 : vector<2x8x1xf32>
    %17 = arith.subf %11, %9 : vector<2x8x1xf32>
    %18 = arith.mulf %16, %17 : vector<2x8x1xf32>
    %19 = vector.shape_cast %1 : vector<2x128xf32> to vector<2x1x128xf32>
    %20 = vector.broadcast %8 : vector<2x8x1xf32> to vector<2x8x128xf32>
    %21 = vector.broadcast %19 : vector<2x1x128xf32> to vector<2x8x128xf32>
    %22 = arith.maximumf %20, %21 : vector<2x8x128xf32>
    %23 = vector.shape_cast %3 : vector<2x128xf32> to vector<2x1x128xf32>
    %24 = vector.broadcast %9 : vector<2x8x1xf32> to vector<2x8x128xf32>
    %25 = vector.broadcast %23 : vector<2x1x128xf32> to vector<2x8x128xf32>
    %26 = arith.maximumf %24, %25 : vector<2x8x128xf32>
    %27 = vector.shape_cast %5 : vector<2x128xf32> to vector<2x1x128xf32>
    %28 = vector.broadcast %10 : vector<2x8x1xf32> to vector<2x8x128xf32>
    %29 = vector.broadcast %27 : vector<2x1x128xf32> to vector<2x8x128xf32>
    %30 = arith.minimumf %28, %29 : vector<2x8x128xf32>
    %31 = vector.shape_cast %7 : vector<2x128xf32> to vector<2x1x128xf32>
    %32 = vector.broadcast %11 : vector<2x8x1xf32> to vector<2x8x128xf32>
    %33 = vector.broadcast %31 : vector<2x1x128xf32> to vector<2x8x128xf32>
    %34 = arith.minimumf %32, %33 : vector<2x8x128xf32>
    %35 = arith.subf %30, %22 : vector<2x8x128xf32>
    %cst = arith.constant 0.000000e+00 : f32
    %36 = vector.broadcast %cst : f32 to vector<2x8x128xf32>
    %37 = arith.maximumf %35, %36 : vector<2x8x128xf32>
    %38 = arith.subf %34, %26 : vector<2x8x128xf32>
    %cst_20 = arith.constant 0.000000e+00 : f32
    %39 = vector.broadcast %cst_20 : f32 to vector<2x8x128xf32>
    %40 = arith.maximumf %38, %39 : vector<2x8x128xf32>
    %41 = arith.mulf %37, %40 : vector<2x8x128xf32>
    %42 = vector.broadcast %18 : vector<2x8x1xf32> to vector<2x8x128xf32>
    %43 = vector.broadcast %15 : vector<2x1x128xf32> to vector<2x8x128xf32>
    %44 = arith.addf %42, %43 : vector<2x8x128xf32>
    %45 = arith.subf %44, %41 : vector<2x8x128xf32>
    %cst_21 = arith.constant 9.99999997E-7 : f32
    %46 = vector.broadcast %cst_21 : f32 to vector<2x8x128xf32>
    %47 = arith.maximumf %45, %46 : vector<2x8x128xf32>
    %48 = arith.divf %41, %47 : vector<2x8x128xf32>
    %cst_22 = arith.constant dense<0xFF800000> : vector<2x128xf32>
    %49 = vector.multi_reduction <maximumf>, %48, %cst_22 [1] : vector<2x8x128xf32> to vector<2x128xf32>
    %50 = tpu.iota {dimensions = array<i32: 1>} : vector<2x8x128xi32>
    %51 = arith.sitofp %50 : vector<2x8x128xi32> to vector<2x8x128xf32>
    %52 = vector.shape_cast %49 : vector<2x128xf32> to vector<2x1x128xf32>
    %53 = vector.broadcast %52 : vector<2x1x128xf32> to vector<2x8x128xf32>
    %54 = arith.cmpf oge, %48, %53 : vector<2x8x128xf32>
    %cst_23 = arith.constant 8.000000e+00 : f32
    %55 = vector.broadcast %cst_23 : f32 to vector<2x8x128xf32>
    %56 = arith.select %54, %51, %55 : vector<2x8x128xi1>, vector<2x8x128xf32>
    %cst_24 = arith.constant dense<0x7F800000> : vector<2x128xf32>
    %57 = vector.multi_reduction <minimumf>, %56, %cst_24 [1] : vector<2x8x128xf32> to vector<2x128xf32>
    %cst_25 = arith.constant 0.699999988 : f32
    %58 = vector.broadcast %cst_25 : f32 to vector<2x128xf32>
    %59 = arith.cmpf oge, %49, %58 : vector<2x128xf32>
    %cst_26 = arith.constant 0.000000e+00 : f32
    %60 = vector.broadcast %cst_26 : f32 to vector<2x128xf32>
    %61 = arith.select %59, %57, %60 : vector<2x128xi1>, vector<2x128xf32>
    %62 = vector.shape_cast %61 : vector<2x128xf32> to vector<2x1x128xf32>
    %63 = vector.broadcast %62 : vector<2x1x128xf32> to vector<2x8x128xf32>
    %64 = arith.cmpf oeq, %51, %63 : vector<2x8x128xf32>
    %65 = arith.extui %64 : vector<2x8x128xi1> to vector<2x8x128xi32>
    %66 = arith.sitofp %65 : vector<2x8x128xi32> to vector<2x8x128xf32>
    %c0_27 = arith.constant 0 : index
    %c0_28 = arith.constant 0 : index
    %c0_29 = arith.constant 0 : index
    %67 = vector.load %arg3[%c0_27, %c0_28, %c0_29] : memref<2x16x8xf32, #tpu.memory_space<vmem>>, vector<2x16x8xf32>
    "tpu.trace_start"() <{level = 10 : i32, message = "bcg,bgp->bcp"}> : () -> ()
    %cst_30 = arith.constant dense<0.000000e+00> : vector<2x16x128xf32>
    %68 = tpu.matmul %67, %66, %cst_30 {dimension_numbers = #tpu.dot_dimension_numbers<[2], [1], [1], [2], [0, 0, 0, 1, 1, 2], [0], [0]>} : vector<2x16x8xf32>, vector<2x8x128xf32>, vector<2x16x128xf32> -> vector<2x16x128xf32>
    "tpu.trace_stop"() : () -> ()
    %69 = vector.extract_strided_slice %68 {offsets = [0, 0, 0], sizes = [2, 1, 128], strides = [1, 1, 1]} : vector<2x16x128xf32> to vector<2x1x128xf32>
    %70 = vector.shape_cast %69 : vector<2x1x128xf32> to vector<2x128xf32>
    %71 = vector.extract_strided_slice %68 {offsets = [0, 5, 0], sizes = [2, 1, 128], strides = [1, 1, 1]} : vector<2x16x128xf32> to vector<2x1x128xf32>
    %72 = vector.shape_cast %71 : vector<2x1x128xf32> to vector<2x128xf32>
    %73 = arith.addf %70, %72 : vector<2x128xf32>
    %74 = vector.extract_strided_slice %68 {offsets = [0, 10, 0], sizes = [2, 1, 128], strides = [1, 1, 1]} : vector<2x16x128xf32> to vector<2x1x128xf32>
    %75 = vector.shape_cast %74 : vector<2x1x128xf32> to vector<2x128xf32>
    %76 = arith.addf %73, %75 : vector<2x128xf32>
    %77 = vector.extract_strided_slice %68 {offsets = [0, 1, 0], sizes = [2, 1, 128], strides = [1, 1, 1]} : vector<2x16x128xf32> to vector<2x1x128xf32>
    %78 = vector.shape_cast %77 : vector<2x1x128xf32> to vector<2x128xf32>
    %79 = vector.extract_strided_slice %68 {offsets = [0, 6, 0], sizes = [2, 1, 128], strides = [1, 1, 1]} : vector<2x16x128xf32> to vector<2x1x128xf32>
    %80 = vector.shape_cast %79 : vector<2x1x128xf32> to vector<2x128xf32>
    %81 = arith.addf %78, %80 : vector<2x128xf32>
    %82 = vector.extract_strided_slice %68 {offsets = [0, 11, 0], sizes = [2, 1, 128], strides = [1, 1, 1]} : vector<2x16x128xf32> to vector<2x1x128xf32>
    %83 = vector.shape_cast %82 : vector<2x1x128xf32> to vector<2x128xf32>
    %84 = arith.addf %81, %83 : vector<2x128xf32>
    %85 = vector.extract_strided_slice %68 {offsets = [0, 2, 0], sizes = [2, 1, 128], strides = [1, 1, 1]} : vector<2x16x128xf32> to vector<2x1x128xf32>
    %86 = vector.shape_cast %85 : vector<2x1x128xf32> to vector<2x128xf32>
    %87 = vector.extract_strided_slice %68 {offsets = [0, 7, 0], sizes = [2, 1, 128], strides = [1, 1, 1]} : vector<2x16x128xf32> to vector<2x1x128xf32>
    %88 = vector.shape_cast %87 : vector<2x1x128xf32> to vector<2x128xf32>
    %89 = arith.addf %86, %88 : vector<2x128xf32>
    %90 = vector.extract_strided_slice %68 {offsets = [0, 12, 0], sizes = [2, 1, 128], strides = [1, 1, 1]} : vector<2x16x128xf32> to vector<2x1x128xf32>
    %91 = vector.shape_cast %90 : vector<2x1x128xf32> to vector<2x128xf32>
    %92 = arith.addf %89, %91 : vector<2x128xf32>
    %93 = vector.extract_strided_slice %68 {offsets = [0, 3, 0], sizes = [2, 1, 128], strides = [1, 1, 1]} : vector<2x16x128xf32> to vector<2x1x128xf32>
    %94 = vector.shape_cast %93 : vector<2x1x128xf32> to vector<2x128xf32>
    %95 = vector.extract_strided_slice %68 {offsets = [0, 8, 0], sizes = [2, 1, 128], strides = [1, 1, 1]} : vector<2x16x128xf32> to vector<2x1x128xf32>
    %96 = vector.shape_cast %95 : vector<2x1x128xf32> to vector<2x128xf32>
    %97 = arith.addf %94, %96 : vector<2x128xf32>
    %98 = vector.extract_strided_slice %68 {offsets = [0, 13, 0], sizes = [2, 1, 128], strides = [1, 1, 1]} : vector<2x16x128xf32> to vector<2x1x128xf32>
    %99 = vector.shape_cast %98 : vector<2x1x128xf32> to vector<2x128xf32>
    %100 = arith.addf %97, %99 : vector<2x128xf32>
    %101 = vector.extract_strided_slice %68 {offsets = [0, 4, 0], sizes = [2, 1, 128], strides = [1, 1, 1]} : vector<2x16x128xf32> to vector<2x1x128xf32>
    %102 = vector.shape_cast %101 : vector<2x1x128xf32> to vector<2x128xf32>
    %103 = vector.extract_strided_slice %68 {offsets = [0, 9, 0], sizes = [2, 1, 128], strides = [1, 1, 1]} : vector<2x16x128xf32> to vector<2x1x128xf32>
    %104 = vector.shape_cast %103 : vector<2x1x128xf32> to vector<2x128xf32>
    %105 = arith.addf %102, %104 : vector<2x128xf32>
    %106 = vector.extract_strided_slice %68 {offsets = [0, 14, 0], sizes = [2, 1, 128], strides = [1, 1, 1]} : vector<2x16x128xf32> to vector<2x1x128xf32>
    %107 = vector.shape_cast %106 : vector<2x1x128xf32> to vector<2x128xf32>
    %108 = arith.addf %105, %107 : vector<2x128xf32>
    %cst_31 = arith.constant 5.000000e-01 : f32
    %109 = vector.broadcast %cst_31 : f32 to vector<2x128xf32>
    %110 = arith.addf %108, %109 : vector<2x128xf32>
    %111 = arith.fptosi %110 : vector<2x128xf32> to vector<2x128xi32>
    %cst_32 = arith.constant 3.000000e-01 : f32
    %112 = vector.broadcast %cst_32 : f32 to vector<2x128xf32>
    %113 = arith.cmpf olt, %49, %112 : vector<2x128xf32>
    %cst_33 = arith.constant 0.699999988 : f32
    %114 = vector.broadcast %cst_33 : f32 to vector<2x128xf32>
    %115 = arith.cmpf olt, %49, %114 : vector<2x128xf32>
    %c-1_i32 = arith.constant -1 : i32
    %116 = vector.broadcast %c-1_i32 : i32 to vector<2x128xi32>
    %117 = arith.select %115, %116, %111 : vector<2x128xi1>, vector<2x128xi32>
    %c0_i32 = arith.constant 0 : i32
    %118 = vector.broadcast %c0_i32 : i32 to vector<2x128xi32>
    %119 = arith.select %113, %118, %117 : vector<2x128xi1>, vector<2x128xi32>
    %120 = arith.subf %5, %1 : vector<2x128xf32>
    %121 = arith.subf %7, %3 : vector<2x128xf32>
    %cst_34 = arith.constant 5.000000e-01 : f32
    %122 = vector.broadcast %cst_34 : f32 to vector<2x128xf32>
    %123 = arith.mulf %122, %120 : vector<2x128xf32>
    %124 = arith.addf %1, %123 : vector<2x128xf32>
    %cst_35 = arith.constant 5.000000e-01 : f32
    %125 = vector.broadcast %cst_35 : f32 to vector<2x128xf32>
    %126 = arith.mulf %125, %121 : vector<2x128xf32>
    %127 = arith.addf %3, %126 : vector<2x128xf32>
    %128 = arith.subf %92, %76 : vector<2x128xf32>
    %129 = arith.subf %100, %84 : vector<2x128xf32>
    %cst_36 = arith.constant 5.000000e-01 : f32
    %130 = vector.broadcast %cst_36 : f32 to vector<2x128xf32>
    %131 = arith.mulf %130, %128 : vector<2x128xf32>
    %132 = arith.addf %76, %131 : vector<2x128xf32>
    %cst_37 = arith.constant 5.000000e-01 : f32
    %133 = vector.broadcast %cst_37 : f32 to vector<2x128xf32>
    %134 = arith.mulf %133, %129 : vector<2x128xf32>
    %135 = arith.addf %84, %134 : vector<2x128xf32>
    %cst_38 = arith.constant 9.99999997E-7 : f32
    %136 = vector.broadcast %cst_38 : f32 to vector<2x128xf32>
    %137 = arith.maximumf %120, %136 : vector<2x128xf32>
    %138 = tpu.reciprocal %137 {approx = true} : vector<2x128xf32> -> vector<2x128xf32>
    %cst_39 = arith.constant 9.99999997E-7 : f32
    %139 = vector.broadcast %cst_39 : f32 to vector<2x128xf32>
    %140 = arith.maximumf %121, %139 : vector<2x128xf32>
    %141 = tpu.reciprocal %140 {approx = true} : vector<2x128xf32> -> vector<2x128xf32>
    %142 = arith.subf %132, %124 : vector<2x128xf32>
    %cst_40 = arith.constant 1.000000e+01 : f32
    %143 = vector.broadcast %cst_40 : f32 to vector<2x128xf32>
    %144 = arith.mulf %143, %142 : vector<2x128xf32>
    %145 = arith.mulf %144, %138 : vector<2x128xf32>
    %146 = arith.subf %135, %127 : vector<2x128xf32>
    %cst_41 = arith.constant 1.000000e+01 : f32
    %147 = vector.broadcast %cst_41 : f32 to vector<2x128xf32>
    %148 = arith.mulf %147, %146 : vector<2x128xf32>
    %149 = arith.mulf %148, %141 : vector<2x128xf32>
    %cst_42 = arith.constant 9.99999997E-7 : f32
    %150 = vector.broadcast %cst_42 : f32 to vector<2x128xf32>
    %151 = arith.maximumf %128, %150 : vector<2x128xf32>
    %152 = math.log %151 : vector<2x128xf32>
    %cst_43 = arith.constant 9.99999997E-7 : f32
    %153 = vector.broadcast %cst_43 : f32 to vector<2x128xf32>
    %154 = arith.maximumf %120, %153 : vector<2x128xf32>
    %155 = math.log %154 : vector<2x128xf32>
    %156 = arith.subf %152, %155 : vector<2x128xf32>
    %cst_44 = arith.constant 5.000000e+00 : f32
    %157 = vector.broadcast %cst_44 : f32 to vector<2x128xf32>
    %158 = arith.mulf %157, %156 : vector<2x128xf32>
    %cst_45 = arith.constant 9.99999997E-7 : f32
    %159 = vector.broadcast %cst_45 : f32 to vector<2x128xf32>
    %160 = arith.maximumf %129, %159 : vector<2x128xf32>
    %161 = math.log %160 : vector<2x128xf32>
    %cst_46 = arith.constant 9.99999997E-7 : f32
    %162 = vector.broadcast %cst_46 : f32 to vector<2x128xf32>
    %163 = arith.maximumf %121, %162 : vector<2x128xf32>
    %164 = math.log %163 : vector<2x128xf32>
    %165 = arith.subf %161, %164 : vector<2x128xf32>
    %cst_47 = arith.constant 5.000000e+00 : f32
    %166 = vector.broadcast %cst_47 : f32 to vector<2x128xf32>
    %167 = arith.mulf %166, %165 : vector<2x128xf32>
    %168 = vector.shape_cast %145 : vector<2x128xf32> to vector<1x2x128xf32>
    %169 = vector.shape_cast %149 : vector<2x128xf32> to vector<1x2x128xf32>
    %170 = vector.shape_cast %158 : vector<2x128xf32> to vector<1x2x128xf32>
    %171 = vector.shape_cast %167 : vector<2x128xf32> to vector<1x2x128xf32>
    %172 = tpu.concatenate %168, %169, %170, %171 in 0 : vector<1x2x128xf32>, vector<1x2x128xf32>, vector<1x2x128xf32>, vector<1x2x128xf32> -> vector<4x2x128xf32>
    %c0_48 = arith.constant 0 : index
    %c0_49 = arith.constant 0 : index
    %c0_50 = arith.constant 0 : index
    %173 = vector.load %arg4[%c0_48, %c0_49, %c0_50] : memref<4x2x128xf32, #tpu.memory_space<vmem>>, vector<4x2x128xf32>
    tpu.vector_store %arg4[%c0_48, %c0_49, %c0_50], %172 {strides = array<i32>} : memref<4x2x128xf32, #tpu.memory_space<vmem>>, vector<4x2x128xf32>,
    %c0_51 = arith.constant 0 : index
    %c0_52 = arith.constant 0 : index
    %174 = vector.load %arg5[%c0_51, %c0_52] : memref<2x128xi32, #tpu.memory_space<vmem>>, vector<2x128xi32>
    tpu.vector_store %arg5[%c0_51, %c0_52], %119 {strides = array<i32>} : memref<2x128xi32, #tpu.memory_space<vmem>>, vector<2x128xi32>,
    %175 = arith.fptosi %61 : vector<2x128xf32> to vector<2x128xi32>
    %c0_53 = arith.constant 0 : index
    %c0_54 = arith.constant 0 : index
    %176 = vector.load %arg6[%c0_53, %c0_54] : memref<2x128xi32, #tpu.memory_space<vmem>>, vector<2x128xi32>
    tpu.vector_store %arg6[%c0_53, %c0_54], %175 {strides = array<i32>} : memref<2x128xi32, #tpu.memory_space<vmem>>, vector<2x128xi32>,
    return
  }
  func.func @transform_0(%arg0: i32) -> (i32, i32, i32) {
    %c0_i32 = arith.constant 0 : i32
    %c0_i32_0 = arith.constant 0 : i32
    %c0_i32_1 = arith.constant 0 : i32
    return %c0_i32, %arg0, %c0_i32_0 : i32, i32, i32
  }
  func.func @transform_1(%arg0: i32) -> (i32, i32, i32) {
    %c0_i32 = arith.constant 0 : i32
    %c0_i32_0 = arith.constant 0 : i32
    %c0_i32_1 = arith.constant 0 : i32
    return %arg0, %c0_i32, %c0_i32_0 : i32, i32, i32
  }
  func.func @transform_2(%arg0: i32) -> (i32, i32, i32) {
    %c0_i32 = arith.constant 0 : i32
    %c0_i32_0 = arith.constant 0 : i32
    %c0_i32_1 = arith.constant 0 : i32
    return %arg0, %c0_i32, %c0_i32_0 : i32, i32, i32
  }
  func.func @transform_3(%arg0: i32) -> (i32, i32, i32) {
    %c0_i32 = arith.constant 0 : i32
    %c0_i32_0 = arith.constant 0 : i32
    %c0_i32_1 = arith.constant 0 : i32
    return %c0_i32, %arg0, %c0_i32_0 : i32, i32, i32
  }
  func.func @transform_4(%arg0: i32) -> (i32, i32) {
    %c0_i32 = arith.constant 0 : i32
    %c0_i32_0 = arith.constant 0 : i32
    return %arg0, %c0_i32 : i32, i32
  }
  func.func @transform_5(%arg0: i32) -> (i32, i32) {
    %c0_i32 = arith.constant 0 : i32
    %c0_i32_0 = arith.constant 0 : i32
    return %arg0, %c0_i32 : i32, i32
  }
}

</mosaic_0001>

<bundles_post_ra>
// kernel: tpu_custom_call.1
= control target key start
LH: loop header
LB: loop body
LE: loop exit
PB: predicated region body
PF: predicated region fallthrough
CT: control target
= control target key end

     0   :  { %11 = vsyncpa [#allocation3], 0  ;;  %s816_s0 = inlined_call_operand.vmem [shape: f32[4,2,128], index: 0, kind: input, shape index: {}]   ;;  %s817_s1 = inlined_call_operand.vmem [shape: f32[2,8,4], index: 1, kind: input, shape index: {}]   ;;  %s818_s2 = inlined_call_operand.vmem [shape: f32[2,16,8], index: 2, kind: input, shape index: {}]   ;;  %s819_s3 = inlined_call_operand.hbm [shape: f32[4,2,128], index: 3, kind: output, shape index: {0}]   ;;  %s820_s4 = inlined_call_operand.hbm [shape: s32[2,128], index: 4, kind: output, shape index: {1}]   ;;  %s821_s5 = inlined_call_operand.hbm [shape: s32[2,128], index: 5, kind: output, shape index: {2}]  }
   0x1   :  { %v26_v0 = vld [vmem:[%s817_s1] sm:$0xff] }
   0x2   :  { %12 = vsyncpa [#allocation5], 0  ;;  %s657_s20 = smov 2   ;;  %v27_v1 = vld [vmem:[%s817_s1 + $0x8] sm:$0xff]  ;;  %v658_v2 = vmov 1   ;;  %v659_v3 = vmov 0  }
   0x3   :  { %35 = vrot.lane.b32.xlu0 %v26_v0, %s657_s20  ;;  %554 = vset.pattern.permute.xlu1 %v658_v2  ;;  %v660_v4 = vmov 3   ;;  %v661_v5 = vmov 2   ;;  %s662_s23 = smov 127   ;;  %v709_v18 = vld [vmem:[%s816_s0] sm:$0x3]  ;;  %vm222_vm10 = vcmask 64512  }
   0x4   :  { %553 = vset.pattern.permute.xlu0 %v658_v2  ;;  %552 = vset.pattern.permute.xlu2 %v659_v3  ;;  %v506_v19 = vld [vmem:[%s816_s0 + $0x4] sm:$0x3]  ;;  %v717_v20 = vld [vmem:[%s816_s0 + $0x2] sm:$0x3]  ;;  %v507_v21 = vld [vmem:[%s816_s0 + $0x6] sm:$0x3] }
   0x5   :  { %56 = vperm.xlu2 %552, %v26_v0   ;;  %v54_v22 = vrot.slane %v709_v18, 1  ;;  %v70_v23 = vrot.slane %v717_v20, 1  ;;  %v86_v24 = vrot.slane %v506_v19, 1  ;;  %v102_v25 = vrot.slane %v507_v21, 1  ;;  %s476_s16 = sshll.u32 %s820_s4, 4  ;;  %s665_s17 = smov [#allocation6]   ;;  %s477_s16 = int_to_ptr.hbm [resolvable:$true] %s476_s16 }
   0x6   :  { %v725_v28 = vsub.f32 %v506_v19, %v709_v18  ;;  %v728_v30 = vsub.f32 %v507_v21, %v717_v20  ;;  %v63_v47 = vperm.slane %v709_v18, 0  ;;  %v95_v48 = vperm.slane %v506_v19, 0  ;;  %s792_s18 = sshll.u32 %s665_s17, 4  ;;  %s487_s22 = sshll.u32 %s821_s5, 4  ;;  %s486_s18 = int_to_ptr.vmem [resolvable:$true] %s792_s18  ;;  %s488_s22 = int_to_ptr.hbm [resolvable:$true] %s487_s22 }
   0x7   :  { %v64_v27 = vperm.slane %v54_v22, 0  ;;  %v80_v29 = vperm.slane %v70_v23, 0  ;;  %v96_v31 = vperm.slane %v86_v24, 0  ;;  %v112_v32 = vperm.slane %v102_v25, 0  ;;  %s666_s4 = smov [#allocation2]   ;;  %s462_s24 = sshll.u32 %s819_s3, 4  ;;  %s463_s24 = int_to_ptr.hbm [resolvable:$true] %s462_s24 }
   0x8   :  { %v30_v39 = vmul.f32 %v728_v30, %v725_v28  ;;  %v79_v50 = vperm.slane %v717_v20, 0  ;;  %v111_v51 = vperm.slane %v507_v21, 0  ;;  %v189_v19 = vlaneseq  ;;  %s460_s5 = sshll.u32 %s666_s4, 4  ;;  %s667_s25 = smov 32   ;;  %s461_s5 = int_to_ptr.vmem [resolvable:$true] %s460_s5 }
   0xa   :  { %v32_v43 = vrot.slane %v30_v39, 1  ;;  %v190_v25 = vshrl.u32 %v189_v19, 7 }
   0xb   :  { %37 = vrot.lane.b32.xlu0 %v27_v1, %s657_s20 }
   0xc   :  { %v138_v46 = vperm.slane %v32_v43, 0 }
   0xd   :  { %60 = vperm.xlu2 %552, %v27_v1  }
  0x13   :  { %72 = vperm.xlu0 %553, %v26_v0  }
  0x15   :  { %555 = vset.pattern.permute.xlu2 %v661_v5 }
  0x16   :  { %88 = vperm.xlu2 %555, %v26_v0  }
  0x1b   :  { %558 = vset.pattern.permute.xlu0 %v660_v4 }
  0x1c   :  { %108 = vperm.xlu0 %558, %v27_v1  }
  0x1e   :  { %557 = vset.pattern.permute.xlu2 %v660_v4 }
  0x1f   :  { %104 = vperm.xlu2 %557, %v26_v0  }
  0x24   :  { %560 = vset.pattern.permute.xlu0 %v661_v5 }
  0x27   :  { %559 = vset.pattern.permute.xlu2 %v661_v5 }
  0x5f   :  { %v57_v14 = vpop.permute.xlu2 %56 }
  0x60   :  { %v67_v55 = vmax.f32 %v57_v14, %v63_v47 }
  0x67   :  { %v61_v15 = vpop.permute.xlu2 %60 }
  0x68   :  { %v68_v35 = vmax.f32 %v61_v15, %v64_v27 }
  0x70   :  { %v89_v26 = vpop.permute.xlu2 %88 }
  0x71   :  { %v99_v56 = vmin.f32 %v89_v26, %v95_v48 }
  0x73   :  { %v117_v60 = vsub.f32 %v99_v56, %v67_v55  ;;  %v221_v55 = vld [vmem:[%s818_s2 + $0x18] sm:$0xff]  ;;  %v220_v56 = vld [vmem:[%s818_s2 + $0x10] sm:$0xff] }
  0x75   :  { %v36_v6 = vpop.permute.xlu0 %35  ;;  %v119_v63 = vmax.f32 %v117_v60, 0.0 }
  0x76   :  { %v41_v7 = vsub.f32 %v26_v0, %v36_v6 }
  0x78   :  { %45 = vrot.lane.b32.xlu1 %v41_v7, %s662_s23 }
  0x79   :  { %v105_v40 = vpop.permute.xlu2 %104 }
  0x7a   :  { %v115_v58 = vmin.f32 %v105_v40, %v111_v51 }
  0x7d   :  { %v38_v8 = vpop.permute.xlu0 %37 }
  0x7e   :  { %v42_v9 = vsub.f32 %v27_v1, %v38_v8 }
  0x80   :  { %47 = vrot.lane.b32.xlu1 %v42_v9, %s662_s23 }
  0x85   :  { %v73_v17 = vpop.permute.xlu0 %72 }
  0x86   :  { %v83_v57 = vmax.f32 %v73_v17, %v79_v50 }
  0x88   :  { %76 = vperm.xlu1 %554, %v27_v1   ;;  %v121_v61 = vsub.f32 %v115_v58, %v83_v57  ;;  %v663_v57 = vmov 1.0  }
  0x8a   :  { %v123_v0 = vmax.f32 %v121_v61, 0.0 }
  0x8c   :  { %v125_v6 = vmul.f32 %v123_v0, %v119_v63 }
  0x8e   :  { %v109_v34 = vpop.permute.xlu0 %108 }
  0x8f   :  { %v116_v38 = vmin.f32 %v109_v34, %v112_v32  ;;  %v191_v34 = vcvt.s32.f32 %v190_v25  ;;  %v351_v25 = vmax.f32 %v725_v28, 1e-06 }
  0x90   :  { %556 = vset.pattern.permute.xlu1 %v661_v5 }
  0x91   :  { %92 = vperm.xlu1 %556, %v27_v1   ;;  %v137_v1 = vperm.slane %v30_v39, 0 }
  0xea   :  { %v46_v10 = vpop.permute.xlu1 %45 }
  0xeb   :  { %v51_v11 = vmul.f32 %v46_v10, %v41_v7 }
  0xed   :  { %129 = vperm.xlu1 %556, %v51_v11  }
  0xf2   :  { %v48_v12 = vpop.permute.xlu1 %47 }
  0xf3   :  { %v52_v13 = vmul.f32 %v48_v12, %v42_v9 }
  0xf5   :  { %134 = vperm.xlu2 %559, %v52_v13  }
  0xfa   :  { %v77_v16 = vpop.permute.xlu1 %76 }
  0xfb   :  { %v84_v36 = vmax.f32 %v77_v16, %v80_v29 }
  0xfd   :  { %v122_v42 = vsub.f32 %v116_v38, %v84_v36 }
  0xff   :  { %v124_v45 = vmax.f32 %v122_v42, 0.0 }
 0x103   :  { %v93_v33 = vpop.permute.xlu1 %92 }
 0x104   :  { %v100_v37 = vmin.f32 %v93_v33, %v96_v31 }
 0x106   :  { %v118_v41 = vsub.f32 %v100_v37, %v68_v35 }
 0x108   :  { %v120_v44 = vmax.f32 %v118_v41, 0.0 }
 0x10a   :  { %v126_v52 = vmul.f32 %v124_v45, %v120_v44 }
 0x14f   :  { %v135_v49 = vpop.permute.xlu2 %134 }
 0x150   :  { %v142_v53 = vadd.f32 %v138_v46, %v135_v49 }
 0x152   :  { %v144_v54 = vsub.f32 %v142_v53, %v126_v52 }
 0x154   :  { %v146_v59 = vmax.f32 %v144_v54, 1e-06 }
 0x156   :  { %561 = vrcp.f32 %v146_v59  ;;  %v173_v5 = vand.u32 2147483648, %v146_v59  ;;  %v171_v9 = vand.u32 2147483647, %v146_v59  ;;  %vm167_vm1 = vweird.f32 %v146_v59 }
 0x158   :  { %v174_v12 = vor.u32 1.1754944e-38, %v173_v5  ;;  %vm172_vm3 = vcmp.eq.f32.partialorder %v171_v9, 8.507059e+37  ;;  %v218_v5 = vld [vmem:[%s818_s2] sm:$0xff] }
 0x15c   :  { %v562_v62 = vpop.eup %561 }
 0x15d   :  { %v163_v2 = vmul.f32 %v562_v62, %v146_v59  ;;  %vm168_vm0 = vweird.f32 %v562_v62 }
 0x15e   :  { %vm169_vm2 = vmor %vm167_vm1, %vm168_vm0  ;;  %vm432_vm1 = vcmask 1041409  }
 0x15f   :  { %v164_v3 = vsub.f32 1.0, %v163_v2  ;;  %v130_v4 = vpop.permute.xlu1 %129 }
 0x160   :  { %v141_v7 = vadd.f32 %v137_v1, %v130_v4  ;;  %v219_v4 = vld [vmem:[%s818_s2 + $0x8] sm:$0xff]  ;;  %s664_s2 = smov [#allocation4]  }
 0x161   :  { %v165_v8 = vmul.f32 %v562_v62, %v164_v3  ;;  %s786_s13 = sshll.u32 %s664_s2, 4  ;;  %s475_s13 = int_to_ptr.vmem [resolvable:$true] %s786_s13 }
 0x162   :  { %v143_v10 = vsub.f32 %v141_v7, %v125_v6 }
 0x163   :  { %v166_v11 = vadd.f32 %v562_v62, %v165_v8 }
 0x164   :  { %v145_v13 = vmax.f32 %v143_v10, 1e-06 }
 0x165   :  { %v170_v14 = vsel %vm169_vm2, %v562_v62, %v166_v11 }
 0x166   :  { %v175_v15 = vsel %vm172_vm3, %v174_v12, %v170_v14  ;;  %563 = vrcp.f32 %v145_v13  ;;  %v158_v29 = vand.u32 2147483648, %v145_v13  ;;  %v156_v33 = vand.u32 2147483647, %v145_v13 }
 0x167   :  { %v176_v16 = vmul.f32 %v175_v15, %v126_v52  ;;  %vm152_vm5 = vweird.f32 %v145_v13  ;;  %565 = vlog2.f32 %v351_v25 }
 0x168   :  { %v159_v37 = vor.u32 1.1754944e-38, %v158_v29  ;;  %vm157_vm8 = vcmp.eq.f32.partialorder %v156_v33, 8.507059e+37  ;;  %v353_v29 = vmax.f32 %v728_v30, 1e-06 }
 0x169   :  { %v183_v17 = vrot.slane %v176_v16, 4 }
 0x16a   :  { %567 = vlog2.f32 %v353_v29 }
 0x16b   :  { %v184_v21 = vmax.f32 %v176_v16, %v183_v17  ;;  %569 = vrcp.f32 %v351_v25 }
 0x16c   :  { %v564_v22 = vpop.eup %563  ;;  %571 = vrcp.f32 %v353_v29 }
 0x16d   :  { %v185_v23 = vrot.slane %v184_v21, 2  ;;  %v148_v24 = vmul.f32 %v564_v22, %v145_v13  ;;  %vm153_vm4 = vweird.f32 %v564_v22 }
 0x16e   :  { %vm154_vm6 = vmor %vm152_vm5, %vm153_vm4 }
 0x16f   :  { %v186_v26 = vmax.f32 %v184_v21, %v185_v23  ;;  %v149_v27 = vsub.f32 1.0, %v148_v24 }
 0x171   :  { %v187_v31 = vrot.slane %v186_v26, 1  ;;  %v150_v32 = vmul.f32 %v564_v22, %v149_v27 }
 0x173   :  { %v734_v35 = vmax.f32 %v186_v26, %v187_v31  ;;  %v151_v36 = vadd.f32 %v564_v22, %v150_v32  ;;  %v317_v31 = vmul.f32 0.5, %v725_v28 }
 0x175   :  { %vm193_vm7 = vcmp.ge.f32.partialorder %v176_v16, %v734_v35  ;;  %v155_v38 = vsel %vm154_vm6, %v564_v22, %v151_v36  ;;  %vm209_vm9 = vcmp.ge.f32.partialorder %v734_v35, 0.7  ;;  %vm312_vm3 = vcmp.lt.f32.partialorder %v734_v35, 0.7 }
 0x176   :  { %v160_v39 = vsel %vm157_vm8, %v159_v37, %v155_v38  ;;  %v195_v40 = vsel %vm193_vm7, %v191_v34, 8.0  ;;  %vm310_vm5 = vcmp.lt.f32.partialorder %v734_v35, 0.3  ;;  %vm449_vm8 = vcmask 1045509  }
 0x177   :  { %v161_v41 = vmul.f32 %v160_v39, %v125_v6  ;;  %v202_v42 = vrot.slane %v195_v40, 4  ;;  %v763_v39 = vadd.f32 %v317_v31, %v709_v18 }
 0x179   :  { %v177_v43 = vrot.slane %v161_v41, 4  ;;  %v203_v44 = vmin.f32 %v195_v40, %v202_v42  ;;  %v566_v40 = vpop.eup %565 }
 0x17b   :  { %v178_v45 = vmax.f32 %v161_v41, %v177_v43  ;;  %v204_v46 = vrot.slane %v203_v44, 2  ;;  %v319_v43 = vmul.f32 0.5, %v728_v30 }
 0x17d   :  { %v179_v47 = vrot.slane %v178_v45, 2  ;;  %v205_v48 = vmin.f32 %v203_v44, %v204_v46  ;;  %v568_v46 = vpop.eup %567 }
 0x17e   :  { %v772_v30 = vmul.f32 0.6931472, %v568_v46 }
 0x17f   :  { %v180_v49 = vmax.f32 %v178_v45, %v179_v47  ;;  %v206_v50 = vrot.slane %v205_v48, 1 }
 0x181   :  { %v181_v51 = vrot.slane %v180_v49, 1  ;;  %v207_v52 = vmin.f32 %v205_v48, %v206_v50 }
 0x183   :  { %v738_v53 = vmax.f32 %v180_v49, %v181_v51  ;;  %v211_v54 = vsel %vm209_vm9, %v207_v52, 0.0  ;;  %v356_v51 = vrot.slane %v763_v39, 1  ;;  %v767_v52 = vmul.f32 0.6931472, %v566_v40 }
 0x184   :  { %vm213_vm11 = vcmp.eq.f32.partialorder %v191_v34, %v211_v54  ;;  %v537_v63 = vceil.f32 %v211_v54  ;;  %v538_v0 = vfloor.f32 %v211_v54  ;;  %vm536_vm13 = vcmp.lt.s32.totalorder %v211_v54, 0 }
 0x185   :  { %vm192_vm12 = vcmp.ge.f32.partialorder %v161_v41, %v738_v53  ;;  %513 = vmatpush.msk.msra.mxu1 %vm213_vm11, %v663_v57  ;;  %520 = vmatpush.msk.msra.mxu3 %vm213_vm11, %v663_v57  ;;  %vm208_vm14 = vcmp.ge.f32.partialorder %v738_v53, 0.7  ;;  %vm309_vm4 = vcmp.lt.f32.partialorder %v738_v53, 0.3  ;;  %vm311_vm6 = vcmp.lt.f32.partialorder %v738_v53, 0.7 }
 0x186   :  { %515 = vmatmul.msk.f32.vlgmr.msra.gmra.mxu3 %vm222_vm10, %v221_v55  ;;  %514 = vmatmul.msk.f32.vlgmr.msra.gmra.mxu1 %vm222_vm10, %v220_v56  ;;  %v194_v58 = vsel %vm192_vm12, %v191_v34, 8.0  ;;  %v539_v6 = vsel %vm536_vm13, %v537_v63, %v538_v0 }
 0x187   :  { %v196_v59 = vrot.slane %v194_v58, 4  ;;  %v540_v11 = vcvt.f32.s32 %v539_v6 }
 0x189   :  { %v197_v60 = vmin.f32 %v194_v58, %v196_v59  ;;  %v775_v58 = vpop.eup %569 }
 0x18a   :  { %v572_v6 = vpop.eup %571 }
 0x18b   :  { %v198_v61 = vrot.slane %v197_v60, 2 }
 0x18d   :  { %v199_v62 = vmin.f32 %v197_v60, %v198_v61 }
 0x18f   :  { %v200_v1 = vrot.slane %v199_v62, 1 }
 0x191   :  { %v201_v2 = vmin.f32 %v199_v62, %v200_v1  ;;  %v393_v62 = vrot.slane %v767_v52, 7 }
 0x193   :  { %v210_v3 = vsel %vm208_vm14, %v201_v2, 0.0 }
 0x194   :  { %vm212_vm15 = vcmp.eq.f32.partialorder %v191_v34, %v210_v3  ;;  %vm531_vm0 = vcmp.lt.s32.totalorder %v210_v3, 0  ;;  %v532_v7 = vceil.f32 %v210_v3  ;;  %v533_v8 = vfloor.f32 %v210_v3 }
 0x195   :  { %510 = vmatpush.msk.msra.mxu0 %vm212_vm15, %v663_v57  ;;  %519 = vmatpush.msk.msra.mxu2 %vm212_vm15, %v663_v57  ;;  %v770_v57 = vadd.f32 %v717_v20, %v319_v43  ;;  %v364_v3 = vrot.slane %v775_v58, 1 }
 0x196   :  { %512 = vmatmul.msk.f32.vlgmr.msra.gmra.mxu2 %vm222_vm10, %v219_v4  ;;  %511 = vmatmul.msk.f32.vlgmr.msra.gmra.mxu0 %vm222_vm10, %v218_v5  ;;  %v534_v9 = vsel %vm531_vm0, %v532_v7, %v533_v8  ;;  %v410_v4 = vrot.slane %v772_v30, 6 }
 0x197   :  { %v535_v10 = vcvt.f32.s32 %v534_v9  ;;  %v370_v5 = vrot.slane %v770_v57, 7 }
 0x199   :  { %v454_v12 = vsel %vm432_vm1, %v540_v11, %v535_v10 }
 0x19a   :  { %455 = vst [vmem:[#allocation6] sm:$0x3] %v454_v12 }
 0x203   :  { %v275_v13 = vpop.f32.mrf.mxu1 }
 0x204   :  { %v284_v14 = vrot.slane %v275_v13, 5 }
 0x206   :  { %v288_v15 = vadd.f32 %v284_v14, %v275_v13 }
 0x209   :  { %v278_v16 = vpop.f32.mrf.mxu3 }
 0x20a   :  { %v292_v17 = vrot.slane %v278_v16, 2  ;;  %v298_v19 = vrot.slane %v278_v16, 5 }
 0x20c   :  { %v296_v21 = vadd.f32 %v292_v17, %v288_v15  ;;  %v302_v22 = vadd.f32 %v298_v19, %v275_v13 }
 0x20e   :  { %v304_v23 = vadd.f32 %v302_v22, %v292_v17  ;;  %v324_v24 = vrot.slane %v296_v21, 6 }
 0x210   :  { %v306_v26 = vadd.f32 0.5, %v304_v23  ;;  %v328_v27 = vsub.f32 %v296_v21, %v324_v24  ;;  %v330_v37 = vsub.f32 %v304_v23, %v324_v24 }
 0x212   :  { %v527_v33 = vceil.f32 %v306_v26  ;;  %v528_v34 = vfloor.f32 %v306_v26  ;;  %v332_v36 = vmul.f32 0.5, %v328_v27  ;;  %vm526_vm2 = vcmp.lt.s32.totalorder %v306_v26, 0 }
 0x213   :  { %v246_v32 = vpop.f32.mrf.mxu0  ;;  %v342_v44 = vmul.f32 0.5, %v330_v37  ;;  %v384_v45 = vmax.f32 %v328_v27, 1e-06  ;;  %v401_v47 = vmax.f32 %v330_v37, 1e-06 }
 0x214   :  { %v283_v38 = vrot.slane %v246_v32, 5  ;;  %v336_v41 = vrot.slane %v332_v36, 2  ;;  %v529_v42 = vsel %vm526_vm2, %v527_v33, %v528_v34 }
 0x215   :  { %v530_v18 = vcvt.f32.s32 %v529_v42  ;;  %573 = vlog2.f32 %v384_v45  ;;  %v346_v59 = vrot.slane %v342_v44, 2  ;;  %v392_v42 = vrot.slane %v767_v52, 6 }
 0x216   :  { %v287_v48 = vadd.f32 %v283_v38, %v246_v32  ;;  %v340_v54 = vadd.f32 %v336_v41, %v296_v21  ;;  %575 = vlog2.f32 %v401_v47 }
 0x217   :  { %v314_v63 = vsel %vm312_vm3, 4294967295, %v530_v18  ;;  %v350_v7 = vadd.f32 %v346_v59, %v296_v21 }
 0x218   :  { %v360_v20 = vsub.f32 %v340_v54, %v356_v51  ;;  %v316_v14 = vsel %vm310_vm5, 0, %v314_v63 }
 0x219   :  { %v249_v28 = vpop.f32.mrf.mxu2  ;;  %v374_v35 = vsub.f32 %v350_v7, %v770_v57  ;;  %v448_v25 = vrot.slane %v316_v14, 7 }
 0x21a   :  { %v291_v49 = vrot.slane %v249_v28, 2  ;;  %v297_v50 = vrot.slane %v249_v28, 5  ;;  %v362_v16 = vmul.f32 10.0, %v360_v20  ;;  %v409_v28 = vrot.slane %v772_v30, 5 }
 0x21b   :  { %v574_v10 = vpop.eup %573  ;;  %v376_v40 = vmul.f32 10.0, %v374_v35 }
 0x21c   :  { %v295_v55 = vadd.f32 %v291_v49, %v287_v48  ;;  %v301_v56 = vadd.f32 %v297_v50, %v246_v32  ;;  %v576_v15 = vpop.eup %575  ;;  %v388_v21 = vmul.f32 0.6931472, %v574_v10  ;;  %v378_v32 = vrot.slane %v572_v6, 7 }
 0x21d   :  { %v405_v26 = vmul.f32 0.6931472, %v576_v15  ;;  %v368_v34 = vmul.f32 %v364_v3, %v362_v16  ;;  %v382_v51 = vmul.f32 %v572_v6, %v376_v40 }
 0x21e   :  { %v303_v60 = vadd.f32 %v301_v56, %v291_v49  ;;  %v323_v61 = vrot.slane %v295_v55, 6  ;;  %v397_v41 = vsub.f32 %v388_v21, %v393_v62 }
 0x21f   :  { %v414_v44 = vsub.f32 %v405_v26, %v410_v4 }
 0x220   :  { %v305_v0 = vadd.f32 0.5, %v303_v60  ;;  %v327_v1 = vsub.f32 %v295_v55, %v323_v61  ;;  %v329_v2 = vsub.f32 %v303_v60, %v323_v61  ;;  %v399_v18 = vmul.f32 5.0, %v397_v41 }
 0x221   :  { %v416_v52 = vmul.f32 5.0, %v414_v44 }
 0x222   :  { %vm521_vm7 = vcmp.lt.s32.totalorder %v305_v0, 0  ;;  %v522_v8 = vceil.f32 %v305_v0  ;;  %v523_v9 = vfloor.f32 %v305_v0  ;;  %v331_v11 = vmul.f32 0.5, %v327_v1 }
 0x223   :  { %v341_v12 = vmul.f32 0.5, %v329_v2  ;;  %v383_v13 = vmax.f32 %v327_v1, 1e-06  ;;  %v400_v17 = vmax.f32 %v329_v2, 1e-06  ;;  %v518_v62 = vrot.slane %v416_v52, 10 }
 0x224   :  { %v524_v19 = vsel %vm521_vm7, %v522_v8, %v523_v9  ;;  %v335_v22 = vrot.slane %v331_v11, 2 }
 0x225   :  { %v345_v23 = vrot.slane %v341_v12, 2  ;;  %577 = vlog2.f32 %v383_v13  ;;  %v525_v24 = vcvt.f32.s32 %v524_v19 }
 0x226   :  { %579 = vlog2.f32 %v400_v17  ;;  %v339_v27 = vadd.f32 %v335_v22, %v295_v55 }
 0x227   :  { %v349_v29 = vadd.f32 %v345_v23, %v295_v55  ;;  %v313_v31 = vsel %vm311_vm6, 4294967295, %v525_v24 }
 0x228   :  { %v315_v33 = vsel %vm309_vm4, 0, %v313_v31  ;;  %v359_v36 = vsub.f32 %v339_v27, %v763_v39  ;;  %v431_v39 = vrot.slane %v368_v34, 7 }
 0x229   :  { %v373_v37 = vsub.f32 %v349_v29, %v370_v5  ;;  %v450_v38 = vsel %vm449_vm8, %v448_v25, %v315_v33 }
 0x22a   :  { %451 = vst [vmem:[#allocation4 - $0x4] sm:$0x30] %v450_v38  ;;  %v361_v45 = vmul.f32 10.0, %v359_v36 }
 0x22b   :  { %v578_v43 = vpop.eup %577  ;;  %v375_v53 = vmul.f32 10.0, %v373_v37  ;;  %479 = dma.vmem_to_hbm [thread:$0]  %s475_s13, 32, %s477_s16, [#allocation5]  }
 0x22c   :  { %v580_v46 = vpop.eup %579  ;;  %v386_v47 = vmul.f32 0.6931472, %v578_v43  ;;  %490 = dma.vmem_to_hbm [thread:$0]  %s486_s18, 32, %s488_s22, [#allocation5]   ;;  %v367_v48 = vmul.f32 %v775_v58, %v361_v45  ;;  %v517_v58 = vrot.slane %v399_v18, 9 }
 0x22d   :  { %v381_v49 = vmul.f32 %v378_v32, %v375_v53  ;;  %v403_v50 = vmul.f32 0.6931472, %v580_v46 }
 0x22e   :  { %v396_v54 = vsub.f32 %v386_v47, %v392_v42  ;;  %v433_v57 = vsel %vm432_vm1, %v431_v39, %v367_v48 }
 0x22f   :  { %v413_v55 = vsub.f32 %v403_v50, %v409_v28  ;;  %v419_v56 = vrot.slane %v381_v49, 1  ;;  %444 = vst [vmem:[#allocation2] sm:$0x3] %v433_v57 }
 0x230   :  { %v398_v59 = vmul.f32 5.0, %v396_v54 }
 0x231   :  { %v415_v30 = vmul.f32 5.0, %v413_v55  ;;  %v435_v60 = vsel %vm432_vm1, %v382_v51, %v419_v56 }
 0x232   :  { %v423_v61 = vrot.slane %v398_v59, 2  ;;  %445 = vst [vmem:[#allocation2 + $0x2] sm:$0x3] %v435_v60 }
 0x233   :  { %v427_v63 = vrot.slane %v415_v30, 3 }
 0x234   :  { %v437_v20 = vsel %vm432_vm1, %v517_v58, %v423_v61 }
 0x235   :  { %v439_v0 = vsel %vm432_vm1, %v518_v62, %v427_v63  ;;  %446 = vst [vmem:[#allocation2 + $0x4] sm:$0x3] %v437_v20 }
 0x236   :  { %447 = vst [vmem:[#allocation2 + $0x6] sm:$0x3] %v439_v0 }
 0x237   :  { %468 = dma.vmem_to_hbm [thread:$0]  %s461_s5, 128, %s463_s24, [#allocation3], %s667_s25, %s667_s25, %s657_s20  }
 0x238   :  { %653 = dma.done.wait [#allocation3], 128  }
 0x239   :  { %654 = vsyncadd [#allocation3], 4294967168 }
 0x23a   :  { %655 = dma.done.wait [#allocation5], 64  }
 0x23b   :  { %656 = vsyncadd [#allocation5], 4294967232 }
 0x23c   :  { %503 = vsyncpa [#allocation3], 1 }
 0x23d   :  { %504 = vsyncpa [#allocation5], 1 }

</bundles_post_ra>
